<compile_context>
chip_gen: v6e
topology: v6e:2x2x1
jax: 0.10.0
libtpu: 0.0.40
codegen_flags: <defaults>
</compile_context>

<pallas_src>
import numpy as np
import jax
import jax.numpy as jnp
from jax.experimental import pallas as pl
from jax.experimental.pallas import tpu as pltpu


# ----------------------------- small utilities ------------------------------

def _round_up(x, m):
    return (x + m - 1) // m * m


def _vmem_budget_bytes():
    """Scoped-VMEM budget ≈ 45% of physical VMEM (64 MiB v7x, 128 MiB v5e/v6e)."""
    cap = 64 * 1024 * 1024
    try:
        cap = int(pltpu.get_tpu_info().vmem_capacity_bytes)
    except Exception:
        pass
    return int(max(16 * 1024 * 1024, min(int(cap * 0.45), 100 * 1024 * 1024)))


def _pick_lane_layout(bc, n_sub, d_pad, itemsize, budget):
    """Pad the folded (B*C) lane axis to a multiple of 128 and pick a lane tile that
    is a multiple of 128, divides the padded width, and fits the VMEM budget."""
    bc_pad = _round_up(bc, 128)
    # kernel-1 per-lane VMEM bytes: H & Z tiles double-buffered (cdt) + f32 S temp.
    per_lane = 2 * 2 * n_sub * itemsize + d_pad * 4
    max_tile = max(128, ((budget // 2) // max(per_lane, 1)) // 128 * 128)
    max_tile = min(max_tile, 2048)
    tile, t = 128, 128
    while t <= min(bc_pad, max_tile):
        if bc_pad % t == 0:
            tile = t
        t += 128
    if tile < min(512, max_tile) and bc_pad > 512:
        # no good 128-multiple divisor: pad a bit further so 512-lane tiles divide.
        tile = min(512, max_tile)
        bc_pad = _round_up(bc, tile)
    return bc_pad, tile


def _pick_row_tile(rows):
    """Row tile for kernel 2's second 'parallel' axis (multiple of 8 dividing rows)."""
    if rows <= 512:
        return rows
    for t in (512, 256, 128, 64, 32, 16, 8):
        if rows % t == 0:
            return t
    return rows


# ----------------------------- Pallas kernels ------------------------------

def _propagate_kernel(h_ref, tct_ref, tw_ref, z_ref, cnt_ref):
    """Graph propagation; batch folded into the 128-lane axis (lanes = B*C).

        S = T_cat^T @ H     (all polynomial-order EH_k stacked, f32 accumulation)
        Z = H + Tw @ S      (Tw rows pre-scaled by each node's polynomial coefficients)

    S never leaves VMEM: only its nonzero count (used by the `tran` statistic) is
    written per lane tile, as one small lane-dense (8,128) block.  Both contractions
    are lane-dense MXU matmuls; the grid tiles the lane axis ("parallel").
    """
    h = h_ref[...]                                                      # (N, Lt)
    s = jnp.dot(tct_ref[...], h, preferred_element_type=jnp.float32)   # (D_pad, Lt) f32
    cnt_ref[...] = jnp.full(cnt_ref.shape,
                            jnp.sum((s != 0.0).astype(jnp.float32)),
                            dtype=jnp.float32)
    z = h.astype(jnp.float32) + jnp.dot(tw_ref[...], s.astype(h.dtype),
                                        preferred_element_type=jnp.float32)
    z_ref[...] = z.astype(z_ref.dtype)


def _client_conv_kernel(z_ref, e_ref, w_ref, o_ref):
    """Per-client node-adaptive conv as ONE Khatri-Rao MXU matmul with fused bias.

        zk  = [ e_0*Z | e_1*Z | ... | e_{d-1}*Z | E ]     (rt, d*(C+1))
        out = zk @ [ Wp.reshape(d*C, O) ; bias_pool ]     (rt, O), f32 accumulation

    Equivalent to the reference einsum pair ('nd,dio->nio' then 'bni,nio->bno') plus
    the E @ bias_pool term, without materializing per-node weights and without a
    serial chain of d underfilled matmuls.  Rows are (node-in-client, batch).
    """
    z = z_ref[0]                           # (rt, C)
    e = e_ref[0]                           # (rt, d)   per-row embedding
    d = e.shape[-1]
    zk = jnp.concatenate([e[:, k:k + 1] * z for k in range(d)] + [e], axis=-1)
    o_ref[0] = jnp.dot(zk, w_ref[0],
                       preferred_element_type=jnp.float32).astype(o_ref.dtype)


# ------------------------------- Glue / math --------------------------------

def transform_k(E, k):
    """Entrywise k-fold tensor power of each embedding row, shape (N, d**k).

    Equivalent to the torch `transform` (cartesian_prod based) up to a permutation of
    the d**k axis; every downstream contraction over that axis is permutation
    invariant, so results are identical.
    """
    N = E.shape[0]
    t = jnp.ones((N, 1), E.dtype)
    for _ in range(k):
        t = (t[:, :, None] * E[:, None, :]).reshape(N, -1)
    return t


def avwgcn_forward(x, E, P, mask, weights_pool, bias_pool, nodes_per, act_k,
                   compute_dtype=jnp.bfloat16):
    """Pallas forward for AVWGCN (adptpolu, inter_dropout=0.0) -> (ret, sp, tran)."""
    B, N, C = x.shape
    nc, d, C_in, O = weights_pool.shape
    assert C_in == C

    nodes_arr = np.asarray(nodes_per, dtype=np.int32)
    assert nodes_arr.ndim == 2, "equal-size client groups are required"
    n_per = nodes_arr.shape[1]
    perm = nodes_arr.reshape(-1)                          # original node id of grouped slot
    assert sorted(perm.tolist()) == list(range(N)), "nodes_per must partition all nodes"
    inv_perm = np.argsort(perm).astype(np.int32)          # grouped slot of original node j
    BC = B * C
    rows = n_per * B
    cdt = compute_dtype
    itemsize = jnp.dtype(cdt).itemsize
    budget = _vmem_budget_bytes()

    # ---- masking + layout: client-contiguous node order, batch folded into lanes ----
    # TODO(synk): the mask multiply + node permutation could be fused into kernel 1 via
    # scalar-prefetch row gather; kept in XLA because H_gw is also needed for `sp`.
    H = x * mask                                                         # (B, N, C) f32
    H_gw = jnp.transpose(H[:, perm, :], (1, 0, 2)).reshape(N, BC)        # (N, B*C) f32

    # ---- polynomial basis of node embeddings (wrapper glue, built from E only) ----
    Ts = [transform_k(E, k) for k in range(act_k + 1)]
    T_cat = jnp.concatenate(Ts, axis=1)                                  # (N, D_tot)
    D_tot = T_cat.shape[1]
    T_g = T_cat[perm]                                                    # grouped order
    P_g = jnp.repeat(P[:, 0, :], n_per, axis=0)                          # (N, K+1)
    Tw_g = jnp.concatenate([Ts[k][perm] * P_g[:, k:k + 1] for k in range(act_k + 1)],
                           axis=1)                                       # (N, D_tot)

    # ---- sparsity statistic `sp` (per-client nonzero counts, plain JAX, f32) ----
    # TODO(synk): per-client ragged nonzero bookkeeping stays as one vectorized einsum.
    S_per = jnp.einsum('cmd,cml->cdl',
                       T_g.reshape(nc, n_per, D_tot),
                       H_gw.reshape(nc, n_per, BC))
    sp = 1.0 - jnp.count_nonzero(S_per).astype(jnp.float32) / (S_per.size + 1e-10)

    # ---- padding: D_tot -> multiple of 8 sublanes, B*C -> multiple of 128 lanes ----
    D_pad = _round_up(D_tot, 8)
    BC_pad, lane_tile = _pick_lane_layout(BC, N, D_pad, itemsize, budget)
    num_tiles = BC_pad // lane_tile

    H_pad = jnp.pad(H_gw, ((0, 0), (0, BC_pad - BC))).astype(cdt)             # zero lanes
    Tct_pad = jnp.pad(T_g, ((0, 0), (0, D_pad - D_tot))).T.astype(cdt)        # (D_pad, N)
    Tw_pad = jnp.pad(Tw_g, ((0, 0), (0, D_pad - D_tot))).astype(cdt)          # (N, D_pad)

    # ---- Pallas kernel 1: propagation + in-kernel nonzero count (lane-tiled) ----
    def build_propagate(single_buffer_residents):
        if single_buffer_residents:
            res = lambda bs, im: pl.BlockSpec(bs, im, pipeline_mode=pl.Buffered(1))
        else:
            res = pl.BlockSpec
        return pl.pallas_call(
            _propagate_kernel,
            out_shape=(jax.ShapeDtypeStruct((N, BC_pad), cdt),
                       jax.ShapeDtypeStruct((num_tiles, 8, 128), jnp.float32)),
            grid=(num_tiles,),
            in_specs=[pl.BlockSpec((N, lane_tile), lambda j: (0, j)),
                      res((D_pad, N), lambda j: (0, 0)),       # resident across grid
                      res((N, D_pad), lambda j: (0, 0))],      # resident across grid
            out_specs=(pl.BlockSpec((N, lane_tile), lambda j: (0, j)),
                       pl.BlockSpec((1, 8, 128), lambda j: (j, 0, 0))),
            compiler_params=pltpu.CompilerParams(
                dimension_semantics=("parallel",),
                vmem_limit_bytes=budget),
        )

    try:
        z_pad, nz_tiles = build_propagate(True)(H_pad, Tct_pad, Tw_pad)
    except Exception:
        # Buffered(1) single-buffering of the residents is a pure VMEM optimization;
        # fall back to default double-buffering if this JAX build rejects it.  A real
        # kernel bug would fail identically here and still surface.
        z_pad, nz_tiles = build_propagate(False)(H_pad, Tct_pad, Tw_pad)

    # transmission metric `tran`: nonzero count of S summed over lane tiles
    # (padded rows/lanes of S are structurally zero, so they contribute nothing).
    tran_num = jnp.sum(nz_tiles[:, 0, 0])
    tran = (1.0 - sp + tran_num / (D_tot * BC + 1e-10)) / 2.0

    # ---- Pallas kernel 2: per-client Khatri-Rao conv, grid = (clients, row tiles) ----
    z_g = z_pad[:, :BC]                                          # drop lane padding
    Z_rows = z_g.reshape(nc, rows, C)                            # rows = n_per * B
    E_g = E[perm].reshape(nc, n_per, d)
    # Per-row embeddings (repeated over batch) keep the kernel free of sublane-merging
    # reshapes and make the row-tile axis independent of B; the extra DMA is rows*d
    # elements per client — negligible next to the Z tile.
    E_rows = jnp.broadcast_to(E_g[:, :, None, :], (nc, n_per, B, d)).reshape(nc, rows, d)
    # Fused weights: [weights_pool flattened to (d*C, O) ; bias_pool (d, O)] stacked
    # along the contraction axis, matching the zk column order [k*C+i ...] ++ [k ...].
    W_aug = jnp.concatenate([weights_pool.reshape(nc, d * C, O), bias_pool], axis=1)

    row_tile = _pick_row_tile(rows)
    n_rt = rows // row_tile

    out_rows = pl.pallas_call(
        _client_conv_kernel,
        out_shape=jax.ShapeDtypeStruct((nc, rows, O), jnp.float32),
        grid=(nc, n_rt),
        in_specs=[pl.BlockSpec((1, row_tile, C), lambda c, r: (c, r, 0)),
                  pl.BlockSpec((1, row_tile, d), lambda c, r: (c, r, 0)),
                  pl.BlockSpec((1, d * C + d, O), lambda c, r: (c, 0, 0))],
        out_specs=pl.BlockSpec((1, row_tile, O), lambda c, r: (c, r, 0)),
        compiler_params=pltpu.CompilerParams(
            dimension_semantics=("parallel", "parallel"),
            vmem_limit_bytes=budget),
    )(Z_rows.astype(cdt), E_rows.astype(cdt), W_aug.astype(cdt))

    # rows are (node-in-client, batch); undo the fold + node permutation (output glue)
    ret = jnp.transpose(out_rows.reshape(N, B, O), (1, 0, 2))[:, jnp.asarray(inv_perm), :]
    return ret, sp, tran


# --------------------------- Pure-JAX reference -----------------------------

def reference_forward(x, E, P, mask, weights_pool, bias_pool, nodes_per, act_k):
    H = x * mask
    nc = weights_pool.shape[0]
    indices = jnp.array([i for sub in nodes_per for i in sub])
    Ts = [transform_k(E, k) for k in range(act_k + 1)]
    EH = [jnp.einsum('nd,bnc->bdc', t, H) for t in Ts]

    num = jnp.float32(0.0)
    den = 0
    for cid in range(nc):
        nd = jnp.array(nodes_per[cid])
        for t in Ts:
            eh = jnp.einsum('nd,bnc->bdc', t[nd], H[:, nd, :])
            num = num + jnp.count_nonzero(eh).astype(jnp.float32)
            den += eh.size
    sp = 1.0 - num / (den + 1e-10)
    num2 = sum(jnp.count_nonzero(eh).astype(jnp.float32) for eh in EH)
    den2 = sum(eh.size for eh in EH)
    tran = (1.0 - sp + num2 / (den2 + 1e-10)) / 2.0

    Zs = jnp.stack([jnp.einsum('nd,bdc->bnc', Ts[i], EH[i]) for i in range(act_k + 1)])
    parts = [jnp.einsum('ak,kbnc->abnc', P[cid], Zs[:, :, jnp.array(nodes_per[cid]), :])[0]
             for cid in range(nc)]
    Z_concat = jnp.concatenate(parts, axis=1)
    Z = jnp.zeros_like(Z_concat).at[:, indices, :].set(Z_concat)
    Z = H + Z

    ws = [jnp.einsum('nd,dio->nio', E[jnp.array(nodes_per[cid])], weights_pool[cid])
          for cid in range(nc)]
    bs = [E[jnp.array(nodes_per[cid])] @ bias_pool[cid] for cid in range(nc)]
    x_gconv = [jnp.einsum('bni,nio->bno', Z[:, jnp.array(nodes_per[cid]), :], ws[cid]) + bs[cid]
               for cid in range(nc)]
    ret_concat = jnp.concatenate(x_gconv, axis=1)
    ret = jnp.zeros_like(ret_concat).at[:, indices, :].set(ret_concat)
    return ret, sp, tran


# ---------------------------------- Main -------------------------------------

if __name__ == "__main__":
    B, N, C, O, d, K, nc = 2, 8, 4, 8, 4, 2, 2
    nodes_per = [[0, 2, 4, 6], [1, 3, 5, 7]]   # args.nodes_per (equal-size client groups)

    key = jax.random.PRNGKey(0)
    ks = jax.random.split(key, 6)
    x = jax.random.normal(ks[0], (B, N, C), jnp.float32)
    E = jax.random.normal(ks[1], (N, d), jnp.float32)                  # node_embeddings
    P = jax.random.normal(ks[2], (nc, 1, K + 1), jnp.float32)          # poly_coefficients
    mask = (jax.random.uniform(ks[3], (B, N, C)) > 0.3).astype(jnp.float32)
    weights_pool = 0.1 * jax.random.normal(ks[4], (nc, d, C, O), jnp.float32)
    bias_pool = 0.1 * jax.random.normal(ks[5], (nc, d, O), jnp.float32)

    ret_ref, sp_ref, tran_ref = reference_forward(x, E, P, mask, weights_pool,
                                                  bias_pool, nodes_per, K)

    # f32 operands: tight check of the kernel algebra.
    ret32, sp32, tran32 = avwgcn_forward(x, E, P, mask, weights_pool, bias_pool,
                                         nodes_per, K, compute_dtype=jnp.float32)
    jax.block_until_ready(ret32)
    np.testing.assert_allclose(np.asarray(ret32), np.asarray(ret_ref), rtol=2e-4, atol=2e-4)
    np.testing.assert_allclose(float(sp32), float(sp_ref), atol=1e-5)
    np.testing.assert_allclose(float(tran32), float(tran_ref), atol=1e-5)

    # bf16 operands / f32 accumulation (production config): loose, range-scaled check.
    ret16, sp16, tran16 = avwgcn_forward(x, E, P, mask, weights_pool, bias_pool,
                                         nodes_per, K, compute_dtype=jnp.bfloat16)
    jax.block_until_ready(ret16)
    scale = max(float(jnp.max(jnp.abs(ret_ref))), 1.0)
    np.testing.assert_allclose(np.asarray(ret16), np.asarray(ret_ref),
                               rtol=5e-2, atol=5e-2 * scale)
    np.testing.assert_allclose(float(sp16), float(sp_ref), atol=2e-3)
    np.testing.assert_allclose(float(tran16), float(tran_ref), atol=2e-3)

    print("KERNEL_OK")
</pallas_src>

<mosaic_0001>
module attributes {stable_mosaic.version = 11 : i64} {
  func.func @_propagate_kernel(%arg0: i32, %arg1: memref<8x128xf32, #tpu.memory_space<vmem>>, %arg2: memref<24x8xf32, #tpu.memory_space<vmem>>, %arg3: memref<8x24xf32, #tpu.memory_space<vmem>>, %arg4: memref<8x128xf32, #tpu.memory_space<vmem>>, %arg5: memref<1x8x128xf32, #tpu.memory_space<vmem>>) attributes {dimension_semantics = [#tpu.dimension_semantics<parallel>], iteration_bounds = array<i64: 1>, scalar_prefetch = 0 : i64, scratch_operands = 0 : i64, tpu.core_type = #tpu.core_type<tc>, window_params = [{transform_indices = @transform_0, window_bounds = array<i64: 8, 128>}, {pipeline_mode = #tpu.pipeline_mode<synchronous>, transform_indices = @transform_1, window_bounds = array<i64: 24, 8>}, {pipeline_mode = #tpu.pipeline_mode<synchronous>, transform_indices = @transform_2, window_bounds = array<i64: 8, 24>}, {transform_indices = @transform_3, window_bounds = array<i64: 8, 128>}, {transform_indices = @transform_4, window_bounds = array<i64: 1, 8, 128>}]} {
    %c0 = arith.constant 0 : index
    %c0_0 = arith.constant 0 : index
    %0 = vector.load %arg1[%c0, %c0_0] : memref<8x128xf32, #tpu.memory_space<vmem>>, vector<8x128xf32>
    %c0_1 = arith.constant 0 : index
    %c0_2 = arith.constant 0 : index
    %1 = vector.load %arg2[%c0_1, %c0_2] : memref<24x8xf32, #tpu.memory_space<vmem>>, vector<24x8xf32>
    %cst = arith.constant dense<0.000000e+00> : vector<24x128xf32>
    %2 = tpu.matmul %1, %0, %cst {dimension_numbers = #tpu.dot_dimension_numbers<[1], [0], [0], [1], [0, 0, 1, 1], [], []>} : vector<24x8xf32>, vector<8x128xf32>, vector<24x128xf32> -> vector<24x128xf32>
    %cst_3 = arith.constant 0.000000e+00 : f32
    %3 = vector.broadcast %cst_3 : f32 to vector<24x128xf32>
    %4 = arith.cmpf one, %2, %3 : vector<24x128xf32>
    %5 = arith.extui %4 : vector<24x128xi1> to vector<24x128xi32>
    %6 = arith.sitofp %5 : vector<24x128xi32> to vector<24x128xf32>
    %7 = vector.shape_cast %6 : vector<24x128xf32> to vector<1x24x128xf32>
    %cst_4 = arith.constant dense<0.000000e+00> : vector<1xf32>
    %8 = vector.multi_reduction <add>, %7, %cst_4 [1, 2] : vector<1x24x128xf32> to vector<1xf32>
    %9 = vector.shape_cast %8 : vector<1xf32> to vector<1x1x1xf32>
    %10 = vector.extract %9[0, 0, 0] : f32 from vector<1x1x1xf32>
    %11 = vector.broadcast %10 : f32 to vector<1x8x128xf32>
    %c0_5 = arith.constant 0 : index
    %c0_6 = arith.constant 0 : index
    %c0_7 = arith.constant 0 : index
    %12 = vector.load %arg5[%c0_5, %c0_6, %c0_7] : memref<1x8x128xf32, #tpu.memory_space<vmem>>, vector<1x8x128xf32>
    tpu.vector_store %arg5[%c0_5, %c0_6, %c0_7], %11 {strides = array<i32>} : memref<1x8x128xf32, #tpu.memory_space<vmem>>, vector<1x8x128xf32>,
    %c0_8 = arith.constant 0 : index
    %c0_9 = arith.constant 0 : index
    %13 = vector.load %arg3[%c0_8, %c0_9] : memref<8x24xf32, #tpu.memory_space<vmem>>, vector<8x24xf32>
    %cst_10 = arith.constant dense<0.000000e+00> : vector<8x128xf32>
    %14 = tpu.matmul %13, %2, %cst_10 {dimension_numbers = #tpu.dot_dimension_numbers<[1], [0], [0], [1], [0, 0, 1, 1], [], []>} : vector<8x24xf32>, vector<24x128xf32>, vector<8x128xf32> -> vector<8x128xf32>
    %15 = arith.addf %0, %14 : vector<8x128xf32>
    %c0_11 = arith.constant 0 : index
    %c0_12 = arith.constant 0 : index
    %16 = vector.load %arg4[%c0_11, %c0_12] : memref<8x128xf32, #tpu.memory_space<vmem>>, vector<8x128xf32>
    tpu.vector_store %arg4[%c0_11, %c0_12], %15 {strides = array<i32>} : memref<8x128xf32, #tpu.memory_space<vmem>>, vector<8x128xf32>,
    return
  }
  func.func @transform_0(%arg0: i32) -> (i32, i32) {
    %c0_i32 = arith.constant 0 : i32
    %c0_i32_0 = arith.constant 0 : i32
    return %c0_i32, %arg0 : i32, i32
  }
  func.func @transform_1(%arg0: i32) -> (i32, i32) {
    %c0_i32 = arith.constant 0 : i32
    %c0_i32_0 = arith.constant 0 : i32
    %c0_i32_1 = arith.constant 0 : i32
    return %c0_i32, %c0_i32_0 : i32, i32
  }
  func.func @transform_2(%arg0: i32) -> (i32, i32) {
    %c0_i32 = arith.constant 0 : i32
    %c0_i32_0 = arith.constant 0 : i32
    %c0_i32_1 = arith.constant 0 : i32
    return %c0_i32, %c0_i32_0 : i32, i32
  }
  func.func @transform_3(%arg0: i32) -> (i32, i32) {
    %c0_i32 = arith.constant 0 : i32
    %c0_i32_0 = arith.constant 0 : i32
    return %c0_i32, %arg0 : i32, i32
  }
  func.func @transform_4(%arg0: i32) -> (i32, i32, i32) {
    %c0_i32 = arith.constant 0 : i32
    %c0_i32_0 = arith.constant 0 : i32
    %c0_i32_1 = arith.constant 0 : i32
    return %arg0, %c0_i32, %c0_i32_0 : i32, i32, i32
  }
}

module attributes {stable_mosaic.version = 11 : i64} {
  func.func @_propagate_kernel(%arg0: i32, %arg1: memref<8x128xf32, #tpu.memory_space<vmem>>, %arg2: memref<24x8xf32, #tpu.memory_space<vmem>>, %arg3: memref<8x24xf32, #tpu.memory_space<vmem>>, %arg4: memref<8x128xf32, #tpu.memory_space<vmem>>, %arg5: memref<1x8x128xf32, #tpu.memory_space<vmem>>) attributes {dimension_semantics = [#tpu.dimension_semantics<parallel>], iteration_bounds = array<i64: 1>, scalar_prefetch = 0 : i64, scratch_operands = 0 : i64, tpu.core_type = #tpu.core_type<tc>, window_params = [{transform_indices = @transform_0, window_bounds = array<i64: 8, 128>}, {pipeline_mode = #tpu.pipeline_mode<synchronous>, transform_indices = @transform_1, window_bounds = array<i64: 24, 8>}, {pipeline_mode = #tpu.pipeline_mode<synchronous>, transform_indices = @transform_2, window_bounds = array<i64: 8, 24>}, {transform_indices = @transform_3, window_bounds = array<i64: 8, 128>}, {transform_indices = @transform_4, window_bounds = array<i64: 1, 8, 128>}]} {
    %c0 = arith.constant 0 : index
    %c0_0 = arith.constant 0 : index
    %0 = vector.load %arg1[%c0, %c0_0] : memref<8x128xf32, #tpu.memory_space<vmem>>, vector<8x128xf32>
    %c0_1 = arith.constant 0 : index
    %c0_2 = arith.constant 0 : index
    %1 = vector.load %arg2[%c0_1, %c0_2] : memref<24x8xf32, #tpu.memory_space<vmem>>, vector<24x8xf32>
    %cst = arith.constant dense<0.000000e+00> : vector<24x128xf32>
    %2 = tpu.matmul %1, %0, %cst {dimension_numbers = #tpu.dot_dimension_numbers<[1], [0], [0], [1], [0, 0, 1, 1], [], []>} : vector<24x8xf32>, vector<8x128xf32>, vector<24x128xf32> -> vector<24x128xf32>
    %cst_3 = arith.constant 0.000000e+00 : f32
    %3 = vector.broadcast %cst_3 : f32 to vector<24x128xf32>
    %4 = arith.cmpf one, %2, %3 : vector<24x128xf32>
    %5 = arith.extui %4 : vector<24x128xi1> to vector<24x128xi32>
    %6 = arith.sitofp %5 : vector<24x128xi32> to vector<24x128xf32>
    %7 = vector.shape_cast %6 : vector<24x128xf32> to vector<1x24x128xf32>
    %cst_4 = arith.constant dense<0.000000e+00> : vector<1xf32>
    %8 = vector.multi_reduction <add>, %7, %cst_4 [1, 2] : vector<1x24x128xf32> to vector<1xf32>
    %9 = vector.shape_cast %8 : vector<1xf32> to vector<1x1x1xf32>
    %10 = vector.extract %9[0, 0, 0] : f32 from vector<1x1x1xf32>
    %11 = vector.broadcast %10 : f32 to vector<1x8x128xf32>
    %c0_5 = arith.constant 0 : index
    %c0_6 = arith.constant 0 : index
    %c0_7 = arith.constant 0 : index
    %12 = vector.load %arg5[%c0_5, %c0_6, %c0_7] : memref<1x8x128xf32, #tpu.memory_space<vmem>>, vector<1x8x128xf32>
    tpu.vector_store %arg5[%c0_5, %c0_6, %c0_7], %11 {strides = array<i32>} : memref<1x8x128xf32, #tpu.memory_space<vmem>>, vector<1x8x128xf32>,
    %c0_8 = arith.constant 0 : index
    %c0_9 = arith.constant 0 : index
    %13 = vector.load %arg3[%c0_8, %c0_9] : memref<8x24xf32, #tpu.memory_space<vmem>>, vector<8x24xf32>
    %cst_10 = arith.constant dense<0.000000e+00> : vector<8x128xf32>
    %14 = tpu.matmul %13, %2, %cst_10 {dimension_numbers = #tpu.dot_dimension_numbers<[1], [0], [0], [1], [0, 0, 1, 1], [], []>} : vector<8x24xf32>, vector<24x128xf32>, vector<8x128xf32> -> vector<8x128xf32>
    %15 = arith.addf %0, %14 : vector<8x128xf32>
    %c0_11 = arith.constant 0 : index
    %c0_12 = arith.constant 0 : index
    %16 = vector.load %arg4[%c0_11, %c0_12] : memref<8x128xf32, #tpu.memory_space<vmem>>, vector<8x128xf32>
    tpu.vector_store %arg4[%c0_11, %c0_12], %15 {strides = array<i32>} : memref<8x128xf32, #tpu.memory_space<vmem>>, vector<8x128xf32>,
    return
  }
  func.func @transform_0(%arg0: i32) -> (i32, i32) {
    %c0_i32 = arith.constant 0 : i32
    %c0_i32_0 = arith.constant 0 : i32
    return %c0_i32, %arg0 : i32, i32
  }
  func.func @transform_1(%arg0: i32) -> (i32, i32) {
    %c0_i32 = arith.constant 0 : i32
    %c0_i32_0 = arith.constant 0 : i32
    %c0_i32_1 = arith.constant 0 : i32
    return %c0_i32, %c0_i32_0 : i32, i32
  }
  func.func @transform_2(%arg0: i32) -> (i32, i32) {
    %c0_i32 = arith.constant 0 : i32
    %c0_i32_0 = arith.constant 0 : i32
    %c0_i32_1 = arith.constant 0 : i32
    return %c0_i32, %c0_i32_0 : i32, i32
  }
  func.func @transform_3(%arg0: i32) -> (i32, i32) {
    %c0_i32 = arith.constant 0 : i32
    %c0_i32_0 = arith.constant 0 : i32
    return %c0_i32, %arg0 : i32, i32
  }
  func.func @transform_4(%arg0: i32) -> (i32, i32, i32) {
    %c0_i32 = arith.constant 0 : i32
    %c0_i32_0 = arith.constant 0 : i32
    %c0_i32_1 = arith.constant 0 : i32
    return %arg0, %c0_i32, %c0_i32_0 : i32, i32, i32
  }
}

</mosaic_0001>

<bundles_post_ra>
// kernel: tpu_custom_call.1
= control target key start
LH: loop header
LB: loop body
LE: loop exit
PB: predicated region body
PF: predicated region fallthrough
CT: control target
= control target key end

     0   :  { %10 = vsyncpa [#allocation3], 0  ;;  %vm22_vm0 = vcmask 64512   ;;  %v324_v2 = vmov 0.0   ;;  %vm325_vm1 = vmmov 0   ;;  %s374_s0 = inlined_call_operand.vmem [shape: f32[8,128], index: 0, kind: input, shape index: {}]   ;;  %s375_s1 = inlined_call_operand.vmem [shape: f32[24,8], index: 1, kind: input, shape index: {}]   ;;  %s376_s2 = inlined_call_operand.vmem [shape: f32[8,24], index: 2, kind: input, shape index: {}]   ;;  %s377_s3 = inlined_call_operand.hbm [shape: f32[8,128], index: 3, kind: output, shape index: {0}]   ;;  %s378_s4 = inlined_call_operand.hbm [shape: f32[1,8,128], index: 4, kind: output, shape index: {1}]  }
   0x1   :  { %v18_v0 = vld [vmem:[%s374_s0] sm:$0xff]  ;;  %254 = vmatprep.subr.mxu0 %v324_v2  ;;  %256 = vmatprep.mubr.msk.f32.mxu0 %vm325_vm1, %v324_v2 }
   0x2   :  { %v19_v1 = vld [vmem:[%s375_s1] sm:$0xff] }
   0x3   :  { %11 = vsyncpa [#allocation5], 0  ;;  %255 = vmatpush3.msra.mxu0 %v18_v0  ;;  %265 = vmatprep.subr.mxu1 %v324_v2  ;;  %v20_v3 = vld [vmem:[%s375_s1 + $0x8] sm:$0xff]  ;;  %v21_v4 = vld [vmem:[%s375_s1 + $0x10] sm:$0xff]  ;;  %vm135_vm5 = vcmask 195584   ;;  %s326_s23 = smov [#allocation2]  }
   0x4   :  { %257 = vmatmul.mubr.msk.f32.vlgmr.msra.gmra.mxu0 %vm22_vm0, %v19_v1  ;;  %271 = vmatprep.mubr.msk.f32.mxu1 %vm325_vm1, %v324_v2  ;;  %v134_v16 = vld [vmem:[%s376_s2] sm:$0xff]  ;;  %s217_s24 = sshll.u32 %s326_s23, 4  ;;  %s327_s2 = smov [#allocation4]   ;;  %s218_s24 = int_to_ptr.vmem [resolvable:$true] %s217_s24 }
   0x5   :  { %259 = vmatprep.mubr.msk.f32.mxu0 %vm325_vm1, %v324_v2  ;;  %s227_s25 = sshll.u32 %s327_s2, 4  ;;  %s280_s26 = scalar_lea.vmem %s218_s24, 128  ;;  %s228_s25 = int_to_ptr.vmem [resolvable:$true] %s227_s25 }
   0x6   :  { %p281_p0 = scmp.ne.s32.totalorder %s218_s24, %s280_s26  ;;  %p285_p1 = scmp.lt.s32.totalorder %s218_s24, %s218_s24 }
   0x7   :  { %p286_p2 = scmp.lt.s32.totalorder %s280_s26, %s280_s26 }
   0x8   :  { %260 = vmatmul.mubr.msk.f32.gmra.mxu0 %vm22_vm0, %v20_v3 }
   0x9   :  { %262 = vmatprep.mubr.msk.f32.mxu0 %vm325_vm1, %v324_v2  ;;  %p287_p3 = por %p286_p2, %p285_p1 }
   0xb   :  { %p288_p4 = pnand %p287_p3, %p281_p0 }
   0xc   :  { %263 = vmatmul.mubr.msk.f32.gmra.mxu0 %vm22_vm0, %v21_v4 }
  0xc4   :  { %v98_v5 = vpop.f32.mrf.mxu0 }
  0xc5   :  { %vm112_vm2 = vcmp.ne.f32.partialorder %v98_v5, 0.0 }
  0xc6   :  { %v258_v6 = vpop.f32.mrf.mxu0  ;;  %v242_v10 = vsel %vm112_vm2, 1.0, %v324_v2 }
  0xc8   :  { %v103_v7 = vpop.f32.mrf.mxu0 }
  0xc9   :  { %vm113_vm3 = vcmp.ne.f32.partialorder %v103_v7, 0.0 }
  0xca   :  { %v243_v8 = vsel %vm113_vm3, 1.0, %v324_v2  ;;  %v261_v9 = vpop.f32.mrf.mxu0 }
  0xcb   :  { %v121_v12 = vadd.f32 %v243_v8, %v242_v10 }
  0xcc   :  { %v108_v11 = vpop.f32.mrf.mxu0 }
  0xcd   :  { %vm114_vm4 = vcmp.ne.f32.partialorder %v108_v11, 0.0  ;;  %266 = vmatpush3.msra.mxu1 %v108_v11 }
  0xce   :  { %v264_v13 = vpop.f32.mrf.mxu0  ;;  %267 = vmatprep.subr.mxu1 %v324_v2  ;;  %v244_v14 = vsel %vm114_vm4, 1.0, %v324_v2 }
  0xcf   :  { %268 = vmatpush3.msra.mxu1 %v103_v7  ;;  %v122_v15 = vadd.f32 %v244_v14, %v121_v12 }
  0xd0   :  { %269 = vmatprep.subr.mxu1 %v324_v2 }
  0xd1   :  { %123 = vadd.xlane.f32.xlu0 %v122_v15  ;;  %270 = vmatpush3.msra.mxu1 %v98_v5 }
  0xd2   :  { %272 = vmatmul.mubr.msk.f32.vlgmr.msra.gmra.mxu1 %vm135_vm5, %v134_v16 }
 0x15a   :  { %v124_v17 = vpop.xlane.xlu0 %123 }
 0x15b   :  { %v125_v18 = vrot.slane %v124_v17, 4 }
 0x15d   :  { %v126_v19 = vadd.f32 %v125_v18, %v124_v17 }
 0x15f   :  { %v127_v20 = vrot.slane %v126_v19, 2 }
 0x161   :  { %v128_v21 = vadd.f32 %v127_v20, %v126_v19 }
 0x163   :  { %v129_v22 = vrot.slane %v128_v21, 1 }
 0x165   :  { %v130_v23 = vadd.f32 %v129_v22, %v128_v21 }
 0x167   :  { %274 = vpush %v130_v23 }
 0x192   :  { %v205_v24 = vpop.f32.mrf.mxu1 }
 0x193   :  { %v209_v25 = vadd.f32 %v205_v24, %v18_v0 }
 0x194   :  { %v273_v26 = vpop.f32.mrf.mxu1 }
 0x195   :  { %210 = vst [vmem:[#allocation2] sm:$0xff] %v209_v25 }
 0x196   :  { %291 = shalt.err (!%p288_p4)
}
 0x197   :  { %220 = dma.vmem_to_hbm [thread:$0]  %s218_s24, 128, %s377_s3, [#allocation3]  }
 0x198   :  { %s275_s29 = spop %274  ;;  %s300_s30 = scalar_lea.vmem %s228_s25, 128 }
 0x199   :  { %v132_v27 = vstv %s275_s29  ;;  %p301_p5 = scmp.ne.s32.totalorder %s228_s25, %s300_s30  ;;  %p305_p6 = scmp.lt.s32.totalorder %s228_s25, %s228_s25 }
 0x19a   :  { %133 = vst [vmem:[#allocation4] sm:$0xff] %v132_v27  ;;  %p306_p7 = scmp.lt.s32.totalorder %s300_s30, %s300_s30 }
 0x19c   :  { %p307_p8 = por %p306_p7, %p305_p6 }
 0x19e   :  { %p308_p9 = pnand %p307_p8, %p301_p5 }
 0x1a0   :  { %311 = shalt.err (!%p308_p9)
}
 0x1a1   :  { %230 = dma.vmem_to_hbm [thread:$0]  %s228_s25, 128, %s378_s4, [#allocation5]  }
 0x1a2   :  { %320 = dma.done.wait [#allocation3], 128  }
 0x1a3   :  { %321 = vsyncadd [#allocation3], 4294967168 }
 0x1a4   :  { %322 = dma.done.wait [#allocation5], 128  }
 0x1a5   :  { %323 = vsyncadd [#allocation5], 4294967168 }
 0x1a6   :  { %237 = vsyncpa [#allocation3], 1 }
 0x1a7   :  { %238 = vsyncpa [#allocation5], 1 }

// kernel: tpu_custom_call.1
= control target key start
LH: loop header
LB: loop body
LE: loop exit
PB: predicated region body
PF: predicated region fallthrough
CT: control target
= control target key end

     0   :  { %10 = vsyncpa [#allocation3], 0  ;;  %vm22_vm0 = vcmask 64512   ;;  %v324_v2 = vmov 0.0   ;;  %vm325_vm1 = vmmov 0   ;;  %s374_s0 = inlined_call_operand.vmem [shape: f32[8,128], index: 0, kind: input, shape index: {}]   ;;  %s375_s1 = inlined_call_operand.vmem [shape: f32[24,8], index: 1, kind: input, shape index: {}]   ;;  %s376_s2 = inlined_call_operand.vmem [shape: f32[8,24], index: 2, kind: input, shape index: {}]   ;;  %s377_s3 = inlined_call_operand.hbm [shape: f32[8,128], index: 3, kind: output, shape index: {0}]   ;;  %s378_s4 = inlined_call_operand.hbm [shape: f32[1,8,128], index: 4, kind: output, shape index: {1}]  }
   0x1   :  { %v18_v0 = vld [vmem:[%s374_s0] sm:$0xff]  ;;  %254 = vmatprep.subr.mxu0 %v324_v2  ;;  %256 = vmatprep.mubr.msk.f32.mxu0 %vm325_vm1, %v324_v2 }
   0x2   :  { %v19_v1 = vld [vmem:[%s375_s1] sm:$0xff] }
   0x3   :  { %11 = vsyncpa [#allocation5], 0  ;;  %255 = vmatpush3.msra.mxu0 %v18_v0  ;;  %265 = vmatprep.subr.mxu1 %v324_v2  ;;  %v20_v3 = vld [vmem:[%s375_s1 + $0x8] sm:$0xff]  ;;  %v21_v4 = vld [vmem:[%s375_s1 + $0x10] sm:$0xff]  ;;  %vm135_vm5 = vcmask 195584   ;;  %s326_s23 = smov [#allocation2]  }
   0x4   :  { %257 = vmatmul.mubr.msk.f32.vlgmr.msra.gmra.mxu0 %vm22_vm0, %v19_v1  ;;  %271 = vmatprep.mubr.msk.f32.mxu1 %vm325_vm1, %v324_v2  ;;  %v134_v16 = vld [vmem:[%s376_s2] sm:$0xff]  ;;  %s217_s24 = sshll.u32 %s326_s23, 4  ;;  %s327_s2 = smov [#allocation4]   ;;  %s218_s24 = int_to_ptr.vmem [resolvable:$true] %s217_s24 }
   0x5   :  { %259 = vmatprep.mubr.msk.f32.mxu0 %vm325_vm1, %v324_v2  ;;  %s227_s25 = sshll.u32 %s327_s2, 4  ;;  %s280_s26 = scalar_lea.vmem %s218_s24, 128  ;;  %s228_s25 = int_to_ptr.vmem [resolvable:$true] %s227_s25 }
   0x6   :  { %p281_p0 = scmp.ne.s32.totalorder %s218_s24, %s280_s26  ;;  %p285_p1 = scmp.lt.s32.totalorder %s218_s24, %s218_s24 }
   0x7   :  { %p286_p2 = scmp.lt.s32.totalorder %s280_s26, %s280_s26 }
   0x8   :  { %260 = vmatmul.mubr.msk.f32.gmra.mxu0 %vm22_vm0, %v20_v3 }
   0x9   :  { %262 = vmatprep.mubr.msk.f32.mxu0 %vm325_vm1, %v324_v2  ;;  %p287_p3 = por %p286_p2, %p285_p1 }
   0xb   :  { %p288_p4 = pnand %p287_p3, %p281_p0 }
   0xc   :  { %263 = vmatmul.mubr.msk.f32.gmra.mxu0 %vm22_vm0, %v21_v4 }
  0xc4   :  { %v98_v5 = vpop.f32.mrf.mxu0 }
  0xc5   :  { %vm112_vm2 = vcmp.ne.f32.partialorder %v98_v5, 0.0 }
  0xc6   :  { %v258_v6 = vpop.f32.mrf.mxu0  ;;  %v242_v10 = vsel %vm112_vm2, 1.0, %v324_v2 }
  0xc8   :  { %v103_v7 = vpop.f32.mrf.mxu0 }
  0xc9   :  { %vm113_vm3 = vcmp.ne.f32.partialorder %v103_v7, 0.0 }
  0xca   :  { %v243_v8 = vsel %vm113_vm3, 1.0, %v324_v2  ;;  %v261_v9 = vpop.f32.mrf.mxu0 }
  0xcb   :  { %v121_v12 = vadd.f32 %v243_v8, %v242_v10 }
  0xcc   :  { %v108_v11 = vpop.f32.mrf.mxu0 }
  0xcd   :  { %vm114_vm4 = vcmp.ne.f32.partialorder %v108_v11, 0.0  ;;  %266 = vmatpush3.msra.mxu1 %v108_v11 }
  0xce   :  { %v264_v13 = vpop.f32.mrf.mxu0  ;;  %267 = vmatprep.subr.mxu1 %v324_v2  ;;  %v244_v14 = vsel %vm114_vm4, 1.0, %v324_v2 }
  0xcf   :  { %268 = vmatpush3.msra.mxu1 %v103_v7  ;;  %v122_v15 = vadd.f32 %v244_v14, %v121_v12 }
  0xd0   :  { %269 = vmatprep.subr.mxu1 %v324_v2 }
  0xd1   :  { %123 = vadd.xlane.f32.xlu0 %v122_v15  ;;  %270 = vmatpush3.msra.mxu1 %v98_v5 }
  0xd2   :  { %272 = vmatmul.mubr.msk.f32.vlgmr.msra.gmra.mxu1 %vm135_vm5, %v134_v16 }
 0x15a   :  { %v124_v17 = vpop.xlane.xlu0 %123 }
 0x15b   :  { %v125_v18 = vrot.slane %v124_v17, 4 }
 0x15d   :  { %v126_v19 = vadd.f32 %v125_v18, %v124_v17 }
 0x15f   :  { %v127_v20 = vrot.slane %v126_v19, 2 }
 0x161   :  { %v128_v21 = vadd.f32 %v127_v20, %v126_v19 }
 0x163   :  { %v129_v22 = vrot.slane %v128_v21, 1 }
 0x165   :  { %v130_v23 = vadd.f32 %v129_v22, %v128_v21 }
 0x167   :  { %274 = vpush %v130_v23 }
 0x192   :  { %v205_v24 = vpop.f32.mrf.mxu1 }
 0x193   :  { %v209_v25 = vadd.f32 %v205_v24, %v18_v0 }
 0x194   :  { %v273_v26 = vpop.f32.mrf.mxu1 }
 0x195   :  { %210 = vst [vmem:[#allocation2] sm:$0xff] %v209_v25 }
 0x196   :  { %291 = shalt.err (!%p288_p4)
}
 0x197   :  { %220 = dma.vmem_to_hbm [thread:$0]  %s218_s24, 128, %s377_s3, [#allocation3]  }
 0x198   :  { %s275_s29 = spop %274  ;;  %s300_s30 = scalar_lea.vmem %s228_s25, 128 }
 0x199   :  { %v132_v27 = vstv %s275_s29  ;;  %p301_p5 = scmp.ne.s32.totalorder %s228_s25, %s300_s30  ;;  %p305_p6 = scmp.lt.s32.totalorder %s228_s25, %s228_s25 }
 0x19a   :  { %133 = vst [vmem:[#allocation4] sm:$0xff] %v132_v27  ;;  %p306_p7 = scmp.lt.s32.totalorder %s300_s30, %s300_s30 }
 0x19c   :  { %p307_p8 = por %p306_p7, %p305_p6 }
 0x19e   :  { %p308_p9 = pnand %p307_p8, %p301_p5 }
 0x1a0   :  { %311 = shalt.err (!%p308_p9)
}
 0x1a1   :  { %230 = dma.vmem_to_hbm [thread:$0]  %s228_s25, 128, %s378_s4, [#allocation5]  }
 0x1a2   :  { %320 = dma.done.wait [#allocation3], 128  }
 0x1a3   :  { %321 = vsyncadd [#allocation3], 4294967168 }
 0x1a4   :  { %322 = dma.done.wait [#allocation5], 128  }
 0x1a5   :  { %323 = vsyncadd [#allocation5], 4294967168 }
 0x1a6   :  { %237 = vsyncpa [#allocation3], 1 }
 0x1a7   :  { %238 = vsyncpa [#allocation5], 1 }

</bundles_post_ra>
